<compile_context>
chip_gen: v7x
topology: tpu7x:2x2x1
jax: 0.10.0
libtpu: 0.0.40
codegen_flags: <defaults>
</compile_context>

<pallas_src>
import math
import functools

import jax
import jax.numpy as jnp
from jax.experimental import pallas as pl
from jax.experimental.pallas import tpu as pltpu


def _round_up(x, n):
    return ((x + n - 1) // n) * n


def _mlp_kernel(num_layers, *refs):
    # refs layout: x_ref, (w_ref, b_ref) * num_layers, o_ref
    x_ref = refs[0]
    o_ref = refs[-1]
    param_refs = refs[1:-1]

    h = x_ref[...]                              # (tile_m, in_dim) f32
    for i in range(num_layers):
        w = param_refs[2 * i][...]              # (in_i, out_i), VMEM-resident
        b = param_refs[2 * i + 1][...]          # (1, out_i)
        h = jnp.dot(h, w, preferred_element_type=jnp.float32) + b
        if i < num_layers - 1:
            h = jnp.maximum(h, 0.0)             # F.relu on all but the last layer
    o_ref[...] = h.astype(o_ref.dtype)          # lane-dense store (out padded to 128)


def mlp_forward(x, weights, biases, *, tile_m=1024):
    """Run the fused MLP Pallas kernel.

    x       : [..., input_dim] float32
    weights : list of (in_features, out_features) float32 arrays
    biases  : list of (1, out_features) float32 arrays
    returns : [..., output_dim] float32
    """
    num_layers = len(weights)
    lead_shape = x.shape[:-1]
    in_dim = x.shape[-1]
    out_dim = weights[-1].shape[-1]
    m = int(math.prod(lead_shape)) if lead_shape else 1
    x2d = x.reshape(m, in_dim).astype(jnp.float32)

    # --- lane-dense output: pad last layer to a multiple of 128 features -----
    padded_out = _round_up(out_dim, 128)
    w_last, b_last = weights[-1], biases[-1]
    if padded_out != out_dim:
        w_last = jnp.pad(w_last, ((0, 0), (0, padded_out - out_dim)))
        b_last = jnp.pad(b_last, ((0, 0), (0, padded_out - out_dim)))
    ws = list(weights[:-1]) + [w_last]
    bs = list(biases[:-1]) + [b_last]

    # --- row tiling: sublane-aligned tile, rows padded so blocks divide evenly
    tile = min(int(tile_m), _round_up(m, 8))
    tile = max(8, _round_up(tile, 8))
    m_pad = _round_up(m, tile)
    if m_pad != m:
        x2d = jnp.pad(x2d, ((0, m_pad - m), (0, 0)))
    grid = (m_pad // tile,)

    # --- BlockSpecs -----------------------------------------------------------
    in_specs = [pl.BlockSpec((tile, in_dim), lambda i: (i, 0))]
    operands = [x2d]
    for w, b in zip(ws, bs):
        # constant index_map -> parameters stay resident in VMEM across steps
        in_specs.append(pl.BlockSpec(w.shape, lambda i: (0, 0)))
        in_specs.append(pl.BlockSpec(b.shape, lambda i: (0, 0)))
        operands.append(w)
        operands.append(b)
    out_spec = pl.BlockSpec((tile, padded_out), lambda i: (i, 0))

    # --- cost hint (kernel is HBM/store-bound, MXU occupancy is irrelevant) ---
    flops = 2 * m * sum(int(w.shape[0]) * int(w.shape[1]) for w in weights)
    bytes_accessed = 4 * (x2d.size + m_pad * padded_out
                          + sum(int(w.size) for w in ws)
                          + sum(int(b.size) for b in bs))

    kernel = functools.partial(_mlp_kernel, num_layers)
    out = pl.pallas_call(
        kernel,
        out_shape=jax.ShapeDtypeStruct((m_pad, padded_out), jnp.float32),
        grid=grid,
        in_specs=in_specs,
        out_specs=out_spec,
        compiler_params=pltpu.CompilerParams(
            dimension_semantics=("parallel",),          # rows independent; shards over TCs on v7x
            vmem_limit_bytes=32 * 1024 * 1024,          # well under 64 MiB physical on v7x
        ),
        cost_estimate=pl.CostEstimate(
            flops=flops, transcendentals=0, bytes_accessed=bytes_accessed),
    )(*operands)

    out = out[:m, :out_dim]
    return out.reshape(*lead_shape, out_dim)


def init_mlp_params(key, input_dim, hidden_dim, output_dim, num_layers):
    """Deterministic init matching torch.nn.Linear default (uniform +-1/sqrt(fan_in))."""
    h = [hidden_dim] * (num_layers - 1)
    dims_in = [input_dim] + h
    dims_out = h + [output_dim]
    weights, biases = [], []
    for n, k in zip(dims_in, dims_out):
        key, kw, kb = jax.random.split(key, 3)
        bound = 1.0 / math.sqrt(n)
        # stored as (in, out) so the kernel can do x @ W
        w = jax.random.uniform(kw, (n, k), jnp.float32, -bound, bound)
        b = jax.random.uniform(kb, (1, k), jnp.float32, -bound, bound)
        weights.append(w)
        biases.append(b)
    return weights, biases


def mlp_reference(x, weights, biases):
    """Plain-JAX reference for correctness checking."""
    num_layers = len(weights)
    h = x
    for i, (w, b) in enumerate(zip(weights, biases)):
        h = h @ w + b[0]
        if i < num_layers - 1:
            h = jnp.maximum(h, 0.0)
    return h


if __name__ == "__main__":
    # Small shapes consistent with the module's forward:
    # batch=2, seq=8 queries, input_dim=16, hidden_dim=32, output_dim=8, 3 layers.
    input_dim, hidden_dim, output_dim, num_layers = 16, 32, 8, 3

    key = jax.random.PRNGKey(0)
    key, kx = jax.random.split(key)
    x = jax.random.normal(kx, (2, 8, input_dim), jnp.float32)

    weights, biases = init_mlp_params(key, input_dim, hidden_dim, output_dim, num_layers)

    out = mlp_forward(x, weights, biases)
    out = jax.block_until_ready(out)

    ref = mlp_reference(x, weights, biases)
    assert out.shape == (2, 8, output_dim), out.shape
    assert jnp.allclose(out, ref, atol=1e-5, rtol=1e-5), "mismatch vs reference"

    print("KERNEL_OK")
</pallas_src>

<mosaic_0001>
module attributes {stable_mosaic.version = 11 : i64} {
  func.func @_mlp_kernel(%arg0: i32, %arg1: memref<16x16xf32, #tpu.memory_space<vmem>>, %arg2: memref<16x32xf32, #tpu.memory_space<vmem>>, %arg3: memref<1x32xf32, #tpu.memory_space<vmem>>, %arg4: memref<32x32xf32, #tpu.memory_space<vmem>>, %arg5: memref<1x32xf32, #tpu.memory_space<vmem>>, %arg6: memref<32x128xf32, #tpu.memory_space<vmem>>, %arg7: memref<1x128xf32, #tpu.memory_space<vmem>>, %arg8: memref<16x128xf32, #tpu.memory_space<vmem>>) attributes {dimension_semantics = [#tpu.dimension_semantics<parallel>], iteration_bounds = array<i64: 1>, scalar_prefetch = 0 : i64, scratch_operands = 0 : i64, tpu.core_type = #tpu.core_type<tc>, window_params = [{transform_indices = @transform_0, window_bounds = array<i64: 16, 16>}, {pipeline_mode = #tpu.pipeline_mode<synchronous>, transform_indices = @transform_1, window_bounds = array<i64: 16, 32>}, {pipeline_mode = #tpu.pipeline_mode<synchronous>, transform_indices = @transform_2, window_bounds = array<i64: 1, 32>}, {pipeline_mode = #tpu.pipeline_mode<synchronous>, transform_indices = @transform_3, window_bounds = array<i64: 32, 32>}, {pipeline_mode = #tpu.pipeline_mode<synchronous>, transform_indices = @transform_4, window_bounds = array<i64: 1, 32>}, {pipeline_mode = #tpu.pipeline_mode<synchronous>, transform_indices = @transform_5, window_bounds = array<i64: 32, 128>}, {pipeline_mode = #tpu.pipeline_mode<synchronous>, transform_indices = @transform_6, window_bounds = array<i64: 1, 128>}, {transform_indices = @transform_7, window_bounds = array<i64: 16, 128>}]} {
    %c0 = arith.constant 0 : index
    %c0_0 = arith.constant 0 : index
    %0 = vector.load %arg1[%c0, %c0_0] : memref<16x16xf32, #tpu.memory_space<vmem>>, vector<16x16xf32>
    %c0_1 = arith.constant 0 : index
    %c0_2 = arith.constant 0 : index
    %1 = vector.load %arg2[%c0_1, %c0_2] : memref<16x32xf32, #tpu.memory_space<vmem>>, vector<16x32xf32>
    %c0_3 = arith.constant 0 : index
    %c0_4 = arith.constant 0 : index
    %2 = vector.load %arg3[%c0_3, %c0_4] : memref<1x32xf32, #tpu.memory_space<vmem>>, vector<1x32xf32>
    %cst = arith.constant dense<0.000000e+00> : vector<16x32xf32>
    %3 = tpu.matmul %0, %1, %cst {dimension_numbers = #tpu.dot_dimension_numbers<[1], [0], [0], [1], [0, 0, 1, 1], [], []>} : vector<16x16xf32>, vector<16x32xf32>, vector<16x32xf32> -> vector<16x32xf32>
    %4 = vector.broadcast %2 : vector<1x32xf32> to vector<16x32xf32>
    %5 = arith.addf %3, %4 : vector<16x32xf32>
    %cst_5 = arith.constant 0.000000e+00 : f32
    %6 = vector.broadcast %cst_5 : f32 to vector<16x32xf32>
    %7 = arith.maximumf %5, %6 : vector<16x32xf32>
    %c0_6 = arith.constant 0 : index
    %c0_7 = arith.constant 0 : index
    %8 = vector.load %arg4[%c0_6, %c0_7] : memref<32x32xf32, #tpu.memory_space<vmem>>, vector<32x32xf32>
    %c0_8 = arith.constant 0 : index
    %c0_9 = arith.constant 0 : index
    %9 = vector.load %arg5[%c0_8, %c0_9] : memref<1x32xf32, #tpu.memory_space<vmem>>, vector<1x32xf32>
    %cst_10 = arith.constant dense<0.000000e+00> : vector<16x32xf32>
    %10 = tpu.matmul %7, %8, %cst_10 {dimension_numbers = #tpu.dot_dimension_numbers<[1], [0], [0], [1], [0, 0, 1, 1], [], []>} : vector<16x32xf32>, vector<32x32xf32>, vector<16x32xf32> -> vector<16x32xf32>
    %11 = vector.broadcast %9 : vector<1x32xf32> to vector<16x32xf32>
    %12 = arith.addf %10, %11 : vector<16x32xf32>
    %cst_11 = arith.constant 0.000000e+00 : f32
    %13 = vector.broadcast %cst_11 : f32 to vector<16x32xf32>
    %14 = arith.maximumf %12, %13 : vector<16x32xf32>
    %c0_12 = arith.constant 0 : index
    %c0_13 = arith.constant 0 : index
    %15 = vector.load %arg6[%c0_12, %c0_13] : memref<32x128xf32, #tpu.memory_space<vmem>>, vector<32x128xf32>
    %c0_14 = arith.constant 0 : index
    %c0_15 = arith.constant 0 : index
    %16 = vector.load %arg7[%c0_14, %c0_15] : memref<1x128xf32, #tpu.memory_space<vmem>>, vector<1x128xf32>
    %cst_16 = arith.constant dense<0.000000e+00> : vector<16x128xf32>
    %17 = tpu.matmul %14, %15, %cst_16 {dimension_numbers = #tpu.dot_dimension_numbers<[1], [0], [0], [1], [0, 0, 1, 1], [], []>} : vector<16x32xf32>, vector<32x128xf32>, vector<16x128xf32> -> vector<16x128xf32>
    %18 = vector.broadcast %16 : vector<1x128xf32> to vector<16x128xf32>
    %19 = arith.addf %17, %18 : vector<16x128xf32>
    %c0_17 = arith.constant 0 : index
    %c0_18 = arith.constant 0 : index
    %20 = vector.load %arg8[%c0_17, %c0_18] : memref<16x128xf32, #tpu.memory_space<vmem>>, vector<16x128xf32>
    tpu.vector_store %arg8[%c0_17, %c0_18], %19 {strides = array<i32>} : memref<16x128xf32, #tpu.memory_space<vmem>>, vector<16x128xf32>,
    return
  }
  func.func @transform_0(%arg0: i32) -> (i32, i32) {
    %c0_i32 = arith.constant 0 : i32
    %c0_i32_0 = arith.constant 0 : i32
    return %arg0, %c0_i32 : i32, i32
  }
  func.func @transform_1(%arg0: i32) -> (i32, i32) {
    %c0_i32 = arith.constant 0 : i32
    %c0_i32_0 = arith.constant 0 : i32
    %c0_i32_1 = arith.constant 0 : i32
    return %c0_i32, %c0_i32_0 : i32, i32
  }
  func.func @transform_2(%arg0: i32) -> (i32, i32) {
    %c0_i32 = arith.constant 0 : i32
    %c0_i32_0 = arith.constant 0 : i32
    %c0_i32_1 = arith.constant 0 : i32
    return %c0_i32, %c0_i32_0 : i32, i32
  }
  func.func @transform_3(%arg0: i32) -> (i32, i32) {
    %c0_i32 = arith.constant 0 : i32
    %c0_i32_0 = arith.constant 0 : i32
    %c0_i32_1 = arith.constant 0 : i32
    return %c0_i32, %c0_i32_0 : i32, i32
  }
  func.func @transform_4(%arg0: i32) -> (i32, i32) {
    %c0_i32 = arith.constant 0 : i32
    %c0_i32_0 = arith.constant 0 : i32
    %c0_i32_1 = arith.constant 0 : i32
    return %c0_i32, %c0_i32_0 : i32, i32
  }
  func.func @transform_5(%arg0: i32) -> (i32, i32) {
    %c0_i32 = arith.constant 0 : i32
    %c0_i32_0 = arith.constant 0 : i32
    %c0_i32_1 = arith.constant 0 : i32
    return %c0_i32, %c0_i32_0 : i32, i32
  }
  func.func @transform_6(%arg0: i32) -> (i32, i32) {
    %c0_i32 = arith.constant 0 : i32
    %c0_i32_0 = arith.constant 0 : i32
    %c0_i32_1 = arith.constant 0 : i32
    return %c0_i32, %c0_i32_0 : i32, i32
  }
  func.func @transform_7(%arg0: i32) -> (i32, i32) {
    %c0_i32 = arith.constant 0 : i32
    %c0_i32_0 = arith.constant 0 : i32
    return %arg0, %c0_i32 : i32, i32
  }
}

</mosaic_0001>

<bundles_post_ra>
// kernel: tpu_custom_call.1
= control target key start
LH: loop header
LB: loop body
LE: loop exit
PB: predicated region body
PF: predicated region fallthrough
CT: control target
= control target key end

     0   :  { %12 = vsyncpa [#allocation3], 0  ;;  %s733_s0 = inlined_call_operand.hbm [shape: f32[16,16], index: 0, kind: input, shape index: {}]   ;;  %s734_s1 = inlined_call_operand.hbm [shape: f32[16,32], index: 1, kind: input, shape index: {}]   ;;  %s735_s2 = inlined_call_operand.vmem [shape: f32[1,32], index: 2, kind: input, shape index: {}]   ;;  %s736_s3 = inlined_call_operand.hbm [shape: f32[32,32], index: 3, kind: input, shape index: {}]   ;;  %s737_s4 = inlined_call_operand.vmem [shape: f32[1,32], index: 4, kind: input, shape index: {}]   ;;  %s738_s5 = inlined_call_operand.hbm [shape: f32[32,128], index: 5, kind: input, shape index: {}]   ;;  %s739_s6 = inlined_call_operand.vmem [shape: f32[1,128], index: 6, kind: input, shape index: {}]   ;;  %s740_s7 = inlined_call_operand.hbm [shape: f32[16,128], index: 7, kind: output, shape index: {}]  }
   0x1   :  { %13 = vsyncpa [#allocation6], 0 }
   0x2   :  { %14 = vsyncpa [#allocation9], 0 }
   0x3   :  { %15 = vsyncpa [#allocation4], 0  ;;  %s584_s24 = smov [#allocation5]   ;;  %s585_s26 = smov [#allocation2]  }
   0x4   :  { %s33_s25 = sshll.u32 %s584_s24, 4  ;;  %s21_s27 = sshll.u32 %s585_s26, 4  ;;  %s34_s25 = int_to_ptr.vmem [resolvable:$true] %s33_s25  ;;  %s631_s27 = int_to_ptr.vmem [resolvable:$true] %s21_s27 }
   0x5   :  { %s466_s30 = scalar_lea.hbm %s734_s1, 256 }
   0x6   :  { %p467_p0 = scmp.ne.s32.totalorder %s734_s1, %s466_s30  ;;  %p470_p1 = scmp.lt.u32.totalorder %s466_s30, %s734_s1 }
   0x8   :  { %p472_p2 = pnand %p470_p1, %p467_p0 }
   0xa   :  { %475 = shalt.err (!%p472_p2)
}
   0xb   :  { %s476_s12 = scalar_lea.vmem %s34_s25, 256  ;;  %p481_p4 = scmp.lt.s32.totalorder %s34_s25, %s34_s25 }
   0xc   :  { %p477_p3 = scmp.ne.s32.totalorder %s34_s25, %s476_s12  ;;  %p482_p5 = scmp.lt.s32.totalorder %s476_s12, %s476_s12 }
   0xe   :  { %p483_p6 = por %p482_p5, %p481_p4 }
  0x10   :  { %p484_p7 = pnand %p483_p6, %p477_p3 }
  0x12   :  { %487 = shalt.err (!%p484_p7)
}
  0x13   :  { %s586_s13 = smov 128   ;;  %s587_s14 = smov 8  }
  0x14   :  { %39 = dma.hbm_to_vmem [thread:$0]  %s734_s1, 256, %s34_s25, [#allocation6], %s586_s13, %s586_s13, %s587_s14  }
  0x15   :  { %s488_s19 = scalar_lea.hbm %s733_s0, 256 }
  0x16   :  { %p489_p8 = scmp.ne.s32.totalorder %s733_s0, %s488_s19  ;;  %p492_p9 = scmp.lt.u32.totalorder %s488_s19, %s733_s0 }
  0x18   :  { %p494_p10 = pnand %p492_p9, %p489_p8 }
  0x1a   :  { %497 = shalt.err (!%p494_p10)
}
  0x1b   :  { %s498_s24 = scalar_lea.vmem %s631_s27, 256  ;;  %p503_p12 = scmp.lt.s32.totalorder %s631_s27, %s631_s27 }
  0x1c   :  { %p499_p11 = scmp.ne.s32.totalorder %s631_s27, %s498_s24  ;;  %p504_p13 = scmp.lt.s32.totalorder %s498_s24, %s498_s24 }
  0x1e   :  { %p505_p0 = por %p504_p13, %p503_p12 }
  0x20   :  { %p506_p1 = pnand %p505_p0, %p499_p11 }
  0x22   :  { %509 = shalt.err (!%p506_p1)
}
  0x23   :  { %27 = dma.hbm_to_vmem [thread:$0]  %s733_s0, 256, %s631_s27, [#allocation3], %s586_s13, %s586_s13, %s587_s14  }
  0x24   :  { %s588_s26 = smov [#allocation7]   ;;  %s589_s29 = smov [#allocation8]  }
  0x25   :  { %s47_s28 = sshll.u32 %s588_s26, 4  ;;  %s61_s30 = sshll.u32 %s589_s29, 4  ;;  %s48_s28 = int_to_ptr.vmem [resolvable:$true] %s47_s28  ;;  %s668_s30 = int_to_ptr.vmem [resolvable:$true] %s61_s30 }
  0x26   :  { %s510_s10 = scalar_lea.hbm %s736_s3, 512 }
  0x27   :  { %p511_p2 = scmp.ne.s32.totalorder %s736_s3, %s510_s10  ;;  %p514_p3 = scmp.lt.u32.totalorder %s510_s10, %s736_s3 }
  0x29   :  { %p516_p4 = pnand %p514_p3, %p511_p2 }
  0x2b   :  { %519 = shalt.err (!%p516_p4)
}
  0x2c   :  { %s520_s0 = scalar_lea.vmem %s48_s28, 512  ;;  %p525_p6 = scmp.lt.s32.totalorder %s48_s28, %s48_s28 }
  0x2d   :  { %p521_p5 = scmp.ne.s32.totalorder %s48_s28, %s520_s0  ;;  %p526_p7 = scmp.lt.s32.totalorder %s520_s0, %s520_s0 }
  0x2f   :  { %p527_p8 = por %p526_p7, %p525_p6 }
  0x31   :  { %p528_p9 = pnand %p527_p8, %p521_p5 }
  0x33   :  { %531 = shalt.err (!%p528_p9)
}
  0x34   :  { %53 = dma.hbm_to_vmem [thread:$0]  %s736_s3, 512, %s48_s28, [#allocation6], %s586_s13, %s586_s13, %s587_s14  }
  0x35   :  { %s532_s20 = scalar_lea.hbm %s738_s5, 512 }
  0x36   :  { %p533_p10 = scmp.ne.s32.totalorder %s738_s5, %s532_s20  ;;  %p536_p11 = scmp.lt.u32.totalorder %s532_s20, %s738_s5 }
  0x38   :  { %p538_p12 = pnand %p536_p11, %p533_p10 }
  0x3a   :  { %541 = shalt.err (!%p538_p12)
}
  0x3b   :  { %s542_s1 = scalar_lea.vmem %s668_s30, 512  ;;  %p547_p0 = scmp.lt.s32.totalorder %s668_s30, %s668_s30 }
  0x3c   :  { %p543_p13 = scmp.ne.s32.totalorder %s668_s30, %s542_s1  ;;  %p548_p1 = scmp.lt.s32.totalorder %s542_s1, %s542_s1 }
  0x3e   :  { %p549_p2 = por %p548_p1, %p547_p0 }
  0x40   :  { %p550_p3 = pnand %p549_p2, %p543_p13 }
  0x42   :  { %553 = shalt.err (!%p550_p3)
}
  0x43   :  { %67 = dma.hbm_to_vmem [thread:$0]  %s738_s5, 512, %s668_s30, [#allocation9], %s586_s13, %s586_s13, %s587_s14  }
  0x44   :  { %576 = dma.done.wait [#allocation3], 256  }
  0x45   :  { %577 = vsyncadd [#allocation3], 4294967040 }
  0x46   :  { %578 = dma.done.wait [#allocation6], 768  }
  0x47   :  { %579 = vsyncadd [#allocation6], 4294966528 }
  0x48   :  { %580 = dma.done.wait [#allocation9], 512  }
  0x49   :  { %581 = vsyncadd [#allocation9], 4294966784  ;;  %vm93_vm0 = vcmask 130048   ;;  %v84_v0 = vld [vmem:[#allocation5] sm:$0xff]  ;;  %v85_v1 = vld [vmem:[#allocation5 + $0x8] sm:$0xff]  ;;  %vm188_vm1 = vcmask 261120  }
  0x4a   :  { %v82_v2 = vld [vmem:[#allocation2] sm:$0xff]  ;;  %v439_v3 = vpack.c.bf16 %v85_v1, %v84_v0  ;;  %v178_v5 = vld [vmem:[#allocation7 + $0x8] sm:$0xff]  ;;  %v179_v8 = vld [vmem:[#allocation7 + $0x10] sm:$0xff]  ;;  %s590_s8 = smov [#allocation10]  }
  0x4b   :  { %414 = vmatprep.mubr.msk.f32.mxu0 %vm93_vm0, %v82_v2  ;;  %v177_v4 = vld [vmem:[#allocation7] sm:$0xff]  ;;  %v83_v7 = vld [vmem:[#allocation2 + $0x8] sm:$0xff]  ;;  %v180_v9 = vld [vmem:[#allocation7 + $0x18] sm:$0xff]  ;;  %s371_s9 = sshll.u32 %s590_s8, 4  ;;  %s372_s9 = int_to_ptr.vmem [resolvable:$true] %s371_s9 }
  0x4c   :  { %v443_v6 = vpack.c.bf16 %v178_v5, %v177_v4  ;;  %440 = vmatprep.subr.bf16.mxu0 %v439_v3  ;;  %v447_v10 = vpack.c.bf16 %v180_v9, %v179_v8  ;;  %v272_v11 = vld [vmem:[#allocation8] sm:$0xff]  ;;  %v273_v12 = vld [vmem:[#allocation8 + $0x8] sm:$0xff]  ;;  %v274_v21 = vld [vmem:[#allocation8 + $0x10] sm:$0xff]  ;;  %p559_p5 = scmp.lt.s32.totalorder %s372_s9, %s372_s9 }
  0x4d   :  { %442 = vmatpush3.bf16.msra.mxu0 %v439_v3  ;;  %v451_v13 = vpack.c.bf16 %v273_v12, %v272_v11  ;;  %v385_v14 = vld [vmem:[%s735_s2] ss:$0 sm:$0xff]  ;;  %v275_v22 = vld [vmem:[#allocation8 + $0x18] sm:$0xff] }
  0x4e   :  { %444 = vmatprep.subr.bf16.mxu1 %v443_v6  ;;  %v455_v23 = vpack.c.bf16 %v275_v22, %v274_v21  ;;  %v388_v24 = vld [vmem:[%s737_s4] ss:$0 sm:$0xff]  ;;  %s554_s4 = scalar_lea.vmem %s372_s9, 256 }
  0x4f   :  { %446 = vmatpush3.bf16.msra.mxu1 %v443_v6  ;;  %452 = vmatprep.subr.bf16.mxu0 %v451_v13  ;;  %v391_v31 = vld [vmem:[%s739_s6] ss:$0 sm:$0xff]  ;;  %p555_p4 = scmp.ne.s32.totalorder %s372_s9, %s554_s4  ;;  %p560_p6 = scmp.lt.s32.totalorder %s554_s4, %s554_s4 }
  0x50   :  { %415 = vmatmul.mubr.msk.f32.vlgmr.msra.gmra.mrb[0].mxu0 %vm93_vm0, %v83_v7  ;;  %448 = vmatprep.subr.bf16.mxu1 %v447_v10 }
  0x51   :  { %454 = vmatpush3.bf16.msra.mxu0 %v451_v13  ;;  %p561_p7 = por %p560_p6, %p559_p5 }
  0x52   :  { %456 = vmatprep.subr.bf16.mxu0 %v455_v23 }
  0x53   :  { %450 = vmatpush3.bf16.msra.mxu1 %v447_v10  ;;  %p562_p8 = pnand %p561_p7, %p555_p4 }
  0x55   :  { %458 = vmatpush3.bf16.msra.mxu0 %v455_v23 }
 0x123   :  { %v416_v15 = vpop.f32.mrb[0].mxu0 }
 0x124   :  { %v172_v16 = vadd.f32 %v416_v15, %v385_v14  ;;  %v166_v17 = vpop.f32.mrb[1].mxu0 }
 0x125   :  { %v167_v18 = vadd.f32 %v385_v14, %v166_v17 }
 0x126   :  { %v176_v20 = vmax.f32 %v172_v16, 0.0 }
 0x127   :  { %v175_v19 = vmax.f32 %v167_v18, 0.0 }
 0x129   :  { %425 = vmatprep.mubr.msk.f32.mxu1 %vm188_vm1, %v175_v19 }
 0x12a   :  { %426 = vmatmul.mubr.msk.f32.vlgmr.msra.gmra.mrb[0].mxu1 %vm188_vm1, %v176_v20 }
 0x1fd   :  { %v427_v25 = vpop.f32.mrb[0].mxu1 }
 0x1fe   :  { %v267_v26 = vadd.f32 %v427_v25, %v388_v24  ;;  %v261_v27 = vpop.f32.mrb[1].mxu1 }
 0x1ff   :  { %v262_v28 = vadd.f32 %v388_v24, %v261_v27 }
 0x200   :  { %v271_v30 = vmax.f32 %v267_v26, 0.0 }
 0x201   :  { %v270_v29 = vmax.f32 %v262_v28, 0.0 }
 0x203   :  { %436 = vmatprep.mubr.msk.f32.mxu0 %vm188_vm1, %v270_v29 }
 0x204   :  { %437 = vmatmul.mubr.msk.f32.vlgmr.msra.gmra.mrb[2].mxu0 %vm188_vm1, %v271_v30 }
 0x2d7   :  { %v438_v32 = vpop.f32.mrb[2].mxu0 }
 0x2d8   :  { %v361_v33 = vadd.f32 %v438_v32, %v391_v31  ;;  %v355_v34 = vpop.f32.mrb[3].mxu0 }
 0x2d9   :  { %v356_v35 = vadd.f32 %v391_v31, %v355_v34 }
 0x2da   :  { %365 = vst [vmem:[#allocation10 + $0x8] sm:$0xff] %v361_v33 }
 0x2db   :  { %364 = vst [vmem:[#allocation10] sm:$0xff] %v356_v35 }
 0x2dc   :  { %565 = shalt.err (!%p562_p8)
}
 0x2dd   :  { %s566_s6 = scalar_lea.hbm %s740_s7, 256 }
 0x2de   :  { %p567_p9 = scmp.ne.s32.totalorder %s740_s7, %s566_s6  ;;  %p570_p10 = scmp.lt.u32.totalorder %s566_s6, %s740_s7 }
 0x2e0   :  { %p572_p11 = pnand %p570_p10, %p567_p9 }
 0x2e2   :  { %575 = shalt.err (!%p572_p11)
}
 0x2e3   :  { %377 = dma.vmem_to_hbm [thread:$0]  %s372_s9, 256, %s740_s7, [#allocation4], %s586_s13, %s586_s13, %s587_s14  }
 0x2e4   :  { %582 = dma.done.wait [#allocation4], 256  }
 0x2e5   :  { %583 = vsyncadd [#allocation4], 4294967040 }
 0x2e6   :  { %381 = vsyncpa [#allocation3], 1 }
 0x2e7   :  { %382 = vsyncpa [#allocation6], 1 }
 0x2e8   :  { %383 = vsyncpa [#allocation9], 1 }
 0x2e9   :  { %384 = vsyncpa [#allocation4], 1 }

</bundles_post_ra>
